<compile_context>
chip_gen: v6e
topology: v6e:2x2x1
jax: 0.10.0
libtpu: 0.0.40
codegen_flags: <defaults>
</compile_context>

<pallas_src>
import functools
import math

import jax
import jax.numpy as jnp
from jax.experimental import pallas as pl
from jax.experimental.pallas import tpu as pltpu


def _block_kernel(x_ref,
                  ln1_g_ref, ln1_b_ref,
                  wqkv_ref, wproj_ref, bproj_ref,
                  ln2_g_ref, ln2_b_ref,
                  w1_ref, b1_ref, w2_ref, b2_ref,
                  o_ref,
                  *, n_heads, head_sz, eps):
    """One grid step = one batch element. Full transformer block forward."""
    x = x_ref[0]                       # (T, E) f32
    T, E = x.shape
    D = n_heads * head_sz

    # ---------------- LayerNorm 1 ----------------
    mu = jnp.mean(x, axis=-1, keepdims=True)
    xc = x - mu
    var = jnp.mean(xc * xc, axis=-1, keepdims=True)
    xn = xc * jax.lax.rsqrt(var + eps)
    xn = xn * ln1_g_ref[...] + ln1_b_ref[...]          # (T,E) * (1,E) broadcast

    # ------------- fused QKV projection -------------
    # One MXU pass with N = 3*D instead of 3*n_heads narrow matmuls.
    qkv = jnp.dot(xn, wqkv_ref[...], preferred_element_type=jnp.float32)  # (T, 3D)

    # Causal mask (shared across heads). Large finite negative instead of -inf:
    # exp underflows to exactly 0 and avoids NaN if a row were fully masked.
    row = jax.lax.broadcasted_iota(jnp.int32, (T, T), 0)
    col = jax.lax.broadcasted_iota(jnp.int32, (T, T), 1)
    causal = col <= row

    scale = 1.0 / math.sqrt(head_sz)

    head_outs = []
    for h in range(n_heads):           # static, small loop over heads
        lo = h * head_sz
        q = qkv[:, lo:lo + head_sz] * scale            # fold scale into q: O(T*H)
        k = qkv[:, D + lo:D + lo + head_sz]
        v = qkv[:, 2 * D + lo:2 * D + lo + head_sz]

        # Contract last dims directly on the MXU (no k.T / XLU transpose).
        s = jax.lax.dot_general(q, k, (((1,), (1,)), ((), ())),
                                preferred_element_type=jnp.float32)       # (T, T)
        s = jnp.where(causal, s, -1e30)

        m = jnp.max(s, axis=-1, keepdims=True)
        e = jnp.exp(s - m)
        denom = jnp.sum(e, axis=-1, keepdims=True)
        p = e * pl.reciprocal(denom, approx=True)      # EUP vrcp, VALU-free
        head_outs.append(jnp.dot(p, v, preferred_element_type=jnp.float32))  # (T,H)

    # Concat heads then one wide projection matmul (better MXU utilization
    # than per-head [T,H]@[H,E] accumulation).
    attn_cat = jnp.concatenate(head_outs, axis=-1)                         # (T, D)
    attn_out = jnp.dot(attn_cat, wproj_ref[...],
                       preferred_element_type=jnp.float32) + bproj_ref[...]  # (T, E)

    # Residual 1 (dropout == identity at inference).
    x1 = x + attn_out

    # ---------------- LayerNorm 2 ----------------
    mu2 = jnp.mean(x1, axis=-1, keepdims=True)
    xc2 = x1 - mu2
    var2 = jnp.mean(xc2 * xc2, axis=-1, keepdims=True)
    x2n = xc2 * jax.lax.rsqrt(var2 + eps)
    x2n = x2n * ln2_g_ref[...] + ln2_b_ref[...]

    # ---------------- Feedforward ----------------
    hid = jnp.dot(x2n, w1_ref[...], preferred_element_type=jnp.float32) + b1_ref[...]
    hid = jnp.maximum(hid, 0.0)
    ff_out = jnp.dot(hid, w2_ref[...], preferred_element_type=jnp.float32) + b2_ref[...]

    # Residual 2.
    o_ref[0] = (x1 + ff_out).astype(o_ref.dtype)


def block_forward(x, params, *, n_heads, head_sz, eps=1e-5):
    """x: [B, T, E] f32. params: dict of pre-transposed weights (see header)."""
    B, T, E = x.shape
    D = n_heads * head_sz
    FF = params["w1"].shape[1]

    kernel = functools.partial(_block_kernel,
                               n_heads=n_heads, head_sz=head_sz, eps=eps)

    const2 = lambda b: (0, 0)          # weights: constant block index -> no re-DMA
    return pl.pallas_call(
        kernel,
        out_shape=jax.ShapeDtypeStruct((B, T, E), x.dtype),
        grid_spec=pltpu.PrefetchScalarGridSpec(
            num_scalar_prefetch=0,
            grid=(B,),
            in_specs=[
                pl.BlockSpec((1, T, E), lambda b: (b, 0, 0)),   # x
                pl.BlockSpec((1, E), const2),                   # ln1 gamma
                pl.BlockSpec((1, E), const2),                   # ln1 beta
                pl.BlockSpec((E, 3 * D), const2),               # fused W_qkv
                pl.BlockSpec((D, E), const2),                   # W_proj
                pl.BlockSpec((1, E), const2),                   # b_proj
                pl.BlockSpec((1, E), const2),                   # ln2 gamma
                pl.BlockSpec((1, E), const2),                   # ln2 beta
                pl.BlockSpec((E, FF), const2),                  # W1
                pl.BlockSpec((1, FF), const2),                  # b1
                pl.BlockSpec((FF, E), const2),                  # W2
                pl.BlockSpec((1, E), const2),                   # b2
            ],
            out_specs=pl.BlockSpec((1, T, E), lambda b: (b, 0, 0)),
        ),
        compiler_params=pltpu.CompilerParams(
            dimension_semantics=("parallel",),                  # B>=2 feeds both v7x TCs
            vmem_limit_bytes=32 * 1024 * 1024,                  # safe on v5e/v6e/v7x
        ),
    )(x,
      params["ln1_g"], params["ln1_b"],
      params["wqkv"], params["wproj"], params["bproj"],
      params["ln2_g"], params["ln2_b"],
      params["w1"], params["b1"], params["w2"], params["b2"])


def _reference_block(x, p, *, n_heads, head_sz, eps=1e-5):
    """Pure-JAX reference matching the PyTorch Block.forward (dropout = identity)."""
    def ln(y, g, b):
        mu = y.mean(-1, keepdims=True)
        var = ((y - mu) ** 2).mean(-1, keepdims=True)
        return (y - mu) / jnp.sqrt(var + eps) * g + b

    D = n_heads * head_sz
    T = x.shape[1]
    mask = jnp.tril(jnp.ones((T, T), dtype=bool))

    xn = ln(x, p["ln1_g"][0], p["ln1_b"][0])
    qkv = xn @ p["wqkv"]
    q, k, v = qkv[..., :D], qkv[..., D:2 * D], qkv[..., 2 * D:]

    heads = []
    for h in range(n_heads):
        lo = h * head_sz
        qh, kh, vh = (q[..., lo:lo + head_sz], k[..., lo:lo + head_sz],
                      v[..., lo:lo + head_sz])
        s = jnp.einsum("btd,bsd->bts", qh, kh) / math.sqrt(head_sz)
        s = jnp.where(mask[None], s, -jnp.inf)
        a = jax.nn.softmax(s, axis=-1)
        heads.append(a @ vh)
    attn = jnp.concatenate(heads, axis=-1) @ p["wproj"] + p["bproj"][0]
    x1 = x + attn

    x2n = ln(x1, p["ln2_g"][0], p["ln2_b"][0])
    ff = jnp.maximum(x2n @ p["w1"] + p["b1"][0], 0.0) @ p["w2"] + p["b2"][0]
    return x1 + ff


if __name__ == "__main__":
    # Small shapes consistent with the module: batch=2, seq=8, emb=32,
    # n_heads=2, head_sz=16, ff_dim=4 (FF hidden = 128, lane-dense).
    B, T, E = 2, 8, 32
    n_heads, head_sz, ff_dim = 2, 16, 4
    D = n_heads * head_sz
    FF = E * ff_dim

    key = jax.random.PRNGKey(0)
    ks = jax.random.split(key, 16)

    def linw(k, fan_in, shape):
        bound = 1.0 / math.sqrt(fan_in)
        return jax.random.uniform(k, shape, jnp.float32, -bound, bound)

    x = jax.random.normal(ks[0], (B, T, E), dtype=jnp.float32)

    # Per-head q/k/v weights stored pre-transposed as [E, head_sz]; fused into
    # a single [E, 3*D] operand: [ Q(all heads) | K(all heads) | V(all heads) ].
    wq = linw(ks[1], E, (E, D))
    wk = linw(ks[2], E, (E, D))
    wv = linw(ks[3], E, (E, D))
    wqkv = jnp.concatenate([wq, wk, wv], axis=1)

    params = dict(
        ln1_g=1.0 + 0.1 * jax.random.normal(ks[4], (1, E), jnp.float32),
        ln1_b=0.1 * jax.random.normal(ks[5], (1, E), jnp.float32),
        wqkv=wqkv,
        wproj=linw(ks[6], D, (D, E)),
        bproj=linw(ks[7], D, (1, E)),
        ln2_g=1.0 + 0.1 * jax.random.normal(ks[8], (1, E), jnp.float32),
        ln2_b=0.1 * jax.random.normal(ks[9], (1, E), jnp.float32),
        w1=linw(ks[10], E, (E, FF)),
        b1=linw(ks[11], E, (1, FF)),
        w2=linw(ks[12], FF, (FF, E)),
        b2=linw(ks[13], FF, (1, E)),
    )

    out = block_forward(x, params, n_heads=n_heads, head_sz=head_sz)
    jax.block_until_ready(out)

    ref = _reference_block(x, params, n_heads=n_heads, head_sz=head_sz)
    assert out.shape == (B, T, E)
    # Tolerance covers the EUP approximate reciprocal used for softmax normalize.
    assert jnp.allclose(out, ref, atol=5e-3, rtol=5e-3), "mismatch vs reference"

    print("KERNEL_OK")
</pallas_src>

<mosaic_0001>
module attributes {stable_mosaic.version = 11 : i64} {
  func.func @_block_kernel(%arg0: i32, %arg1: memref<1x8x32xf32, #tpu.memory_space<vmem>>, %arg2: memref<1x32xf32, #tpu.memory_space<vmem>>, %arg3: memref<1x32xf32, #tpu.memory_space<vmem>>, %arg4: memref<32x96xf32, #tpu.memory_space<vmem>>, %arg5: memref<32x32xf32, #tpu.memory_space<vmem>>, %arg6: memref<1x32xf32, #tpu.memory_space<vmem>>, %arg7: memref<1x32xf32, #tpu.memory_space<vmem>>, %arg8: memref<1x32xf32, #tpu.memory_space<vmem>>, %arg9: memref<32x128xf32, #tpu.memory_space<vmem>>, %arg10: memref<1x128xf32, #tpu.memory_space<vmem>>, %arg11: memref<128x32xf32, #tpu.memory_space<vmem>>, %arg12: memref<1x32xf32, #tpu.memory_space<vmem>>, %arg13: memref<1x8x32xf32, #tpu.memory_space<vmem>>) attributes {dimension_semantics = [#tpu.dimension_semantics<parallel>], iteration_bounds = array<i64: 2>, scalar_prefetch = 0 : i64, scratch_operands = 0 : i64, tpu.core_type = #tpu.core_type<tc>, window_params = [{transform_indices = @transform_0, window_bounds = array<i64: 1, 8, 32>}, {pipeline_mode = #tpu.pipeline_mode<synchronous>, transform_indices = @transform_1, window_bounds = array<i64: 1, 32>}, {pipeline_mode = #tpu.pipeline_mode<synchronous>, transform_indices = @transform_2, window_bounds = array<i64: 1, 32>}, {pipeline_mode = #tpu.pipeline_mode<synchronous>, transform_indices = @transform_3, window_bounds = array<i64: 32, 96>}, {pipeline_mode = #tpu.pipeline_mode<synchronous>, transform_indices = @transform_4, window_bounds = array<i64: 32, 32>}, {pipeline_mode = #tpu.pipeline_mode<synchronous>, transform_indices = @transform_5, window_bounds = array<i64: 1, 32>}, {pipeline_mode = #tpu.pipeline_mode<synchronous>, transform_indices = @transform_6, window_bounds = array<i64: 1, 32>}, {pipeline_mode = #tpu.pipeline_mode<synchronous>, transform_indices = @transform_7, window_bounds = array<i64: 1, 32>}, {pipeline_mode = #tpu.pipeline_mode<synchronous>, transform_indices = @transform_8, window_bounds = array<i64: 32, 128>}, {pipeline_mode = #tpu.pipeline_mode<synchronous>, transform_indices = @transform_9, window_bounds = array<i64: 1, 128>}, {pipeline_mode = #tpu.pipeline_mode<synchronous>, transform_indices = @transform_10, window_bounds = array<i64: 128, 32>}, {pipeline_mode = #tpu.pipeline_mode<synchronous>, transform_indices = @transform_11, window_bounds = array<i64: 1, 32>}, {transform_indices = @transform_12, window_bounds = array<i64: 1, 8, 32>}]} {
    %c0 = arith.constant 0 : index
    %c0_0 = arith.constant 0 : index
    %c0_1 = arith.constant 0 : index
    %0 = vector.load %arg1[%c0, %c0_0, %c0_1] : memref<1x8x32xf32, #tpu.memory_space<vmem>>, vector<1x8x32xf32>
    %1 = vector.shape_cast %0 : vector<1x8x32xf32> to vector<8x32xf32>
    %cst = arith.constant dense<0.000000e+00> : vector<8xf32>
    %2 = vector.multi_reduction <add>, %1, %cst [1] : vector<8x32xf32> to vector<8xf32>
    %3 = vector.shape_cast %2 : vector<8xf32> to vector<8x1xf32>
    %cst_2 = arith.constant 3.200000e+01 : f32
    %4 = vector.broadcast %cst_2 : f32 to vector<8x1xf32>
    %5 = arith.divf %3, %4 : vector<8x1xf32>
    %6 = vector.broadcast %5 : vector<8x1xf32> to vector<8x32xf32>
    %7 = arith.subf %1, %6 : vector<8x32xf32>
    %8 = arith.mulf %7, %7 : vector<8x32xf32>
    %cst_3 = arith.constant dense<0.000000e+00> : vector<8xf32>
    %9 = vector.multi_reduction <add>, %8, %cst_3 [1] : vector<8x32xf32> to vector<8xf32>
    %10 = vector.shape_cast %9 : vector<8xf32> to vector<8x1xf32>
    %cst_4 = arith.constant 3.200000e+01 : f32
    %11 = vector.broadcast %cst_4 : f32 to vector<8x1xf32>
    %12 = arith.divf %10, %11 : vector<8x1xf32>
    %cst_5 = arith.constant 9.99999974E-6 : f32
    %13 = vector.broadcast %cst_5 : f32 to vector<8x1xf32>
    %14 = arith.addf %12, %13 : vector<8x1xf32>
    %15 = math.rsqrt %14 : vector<8x1xf32>
    %16 = vector.broadcast %15 : vector<8x1xf32> to vector<8x32xf32>
    %17 = arith.mulf %7, %16 : vector<8x32xf32>
    %c0_6 = arith.constant 0 : index
    %c0_7 = arith.constant 0 : index
    %18 = vector.load %arg2[%c0_6, %c0_7] : memref<1x32xf32, #tpu.memory_space<vmem>>, vector<1x32xf32>
    %19 = vector.broadcast %18 : vector<1x32xf32> to vector<8x32xf32>
    %20 = arith.mulf %17, %19 : vector<8x32xf32>
    %c0_8 = arith.constant 0 : index
    %c0_9 = arith.constant 0 : index
    %21 = vector.load %arg3[%c0_8, %c0_9] : memref<1x32xf32, #tpu.memory_space<vmem>>, vector<1x32xf32>
    %22 = vector.broadcast %21 : vector<1x32xf32> to vector<8x32xf32>
    %23 = arith.addf %20, %22 : vector<8x32xf32>
    %c0_10 = arith.constant 0 : index
    %c0_11 = arith.constant 0 : index
    %24 = vector.load %arg4[%c0_10, %c0_11] : memref<32x96xf32, #tpu.memory_space<vmem>>, vector<32x96xf32>
    %cst_12 = arith.constant dense<0.000000e+00> : vector<8x96xf32>
    %25 = tpu.matmul %23, %24, %cst_12 {dimension_numbers = #tpu.dot_dimension_numbers<[1], [0], [0], [1], [0, 0, 1, 1], [], []>} : vector<8x32xf32>, vector<32x96xf32>, vector<8x96xf32> -> vector<8x96xf32>
    %26 = tpu.iota {dimensions = array<i32: 0>} : vector<8x8xi32>
    %27 = tpu.iota {dimensions = array<i32: 1>} : vector<8x8xi32>
    %28 = arith.cmpi sle, %27, %26 : vector<8x8xi32>
    %29 = vector.extract_strided_slice %25 {offsets = [0, 0], sizes = [8, 16], strides = [1, 1]} : vector<8x96xf32> to vector<8x16xf32>
    %cst_13 = arith.constant 2.500000e-01 : f32
    %30 = vector.broadcast %cst_13 : f32 to vector<8x16xf32>
    %31 = arith.mulf %29, %30 : vector<8x16xf32>
    %32 = vector.extract_strided_slice %25 {offsets = [0, 32], sizes = [8, 16], strides = [1, 1]} : vector<8x96xf32> to vector<8x16xf32>
    %33 = vector.extract_strided_slice %25 {offsets = [0, 64], sizes = [8, 16], strides = [1, 1]} : vector<8x96xf32> to vector<8x16xf32>
    %cst_14 = arith.constant dense<0.000000e+00> : vector<8x8xf32>
    %34 = tpu.matmul %31, %32, %cst_14 {dimension_numbers = #tpu.dot_dimension_numbers<[1], [1], [0], [0], [0, 0, 1, 0], [], []>} : vector<8x16xf32>, vector<8x16xf32>, vector<8x8xf32> -> vector<8x8xf32>
    %cst_15 = arith.constant -1.000000e+30 : f32
    %35 = vector.broadcast %cst_15 : f32 to vector<8x8xf32>
    %36 = arith.select %28, %34, %35 : vector<8x8xi1>, vector<8x8xf32>
    %cst_16 = arith.constant dense<0xFF800000> : vector<8xf32>
    %37 = vector.multi_reduction <maximumf>, %36, %cst_16 [1] : vector<8x8xf32> to vector<8xf32>
    %38 = vector.shape_cast %37 : vector<8xf32> to vector<8x1xf32>
    %39 = vector.broadcast %38 : vector<8x1xf32> to vector<8x8xf32>
    %40 = arith.subf %36, %39 : vector<8x8xf32>
    %41 = math.exp %40 : vector<8x8xf32>
    %cst_17 = arith.constant dense<0.000000e+00> : vector<8xf32>
    %42 = vector.multi_reduction <add>, %41, %cst_17 [1] : vector<8x8xf32> to vector<8xf32>
    %43 = vector.shape_cast %42 : vector<8xf32> to vector<8x1xf32>
    %44 = tpu.reciprocal %43 {approx = true} : vector<8x1xf32> -> vector<8x1xf32>
    %45 = vector.broadcast %44 : vector<8x1xf32> to vector<8x8xf32>
    %46 = arith.mulf %41, %45 : vector<8x8xf32>
    %cst_18 = arith.constant dense<0.000000e+00> : vector<8x16xf32>
    %47 = tpu.matmul %46, %33, %cst_18 {dimension_numbers = #tpu.dot_dimension_numbers<[1], [0], [0], [1], [0, 0, 1, 1], [], []>} : vector<8x8xf32>, vector<8x16xf32>, vector<8x16xf32> -> vector<8x16xf32>
    %48 = vector.extract_strided_slice %25 {offsets = [0, 16], sizes = [8, 16], strides = [1, 1]} : vector<8x96xf32> to vector<8x16xf32>
    %cst_19 = arith.constant 2.500000e-01 : f32
    %49 = vector.broadcast %cst_19 : f32 to vector<8x16xf32>
    %50 = arith.mulf %48, %49 : vector<8x16xf32>
    %51 = vector.extract_strided_slice %25 {offsets = [0, 48], sizes = [8, 16], strides = [1, 1]} : vector<8x96xf32> to vector<8x16xf32>
    %52 = vector.extract_strided_slice %25 {offsets = [0, 80], sizes = [8, 16], strides = [1, 1]} : vector<8x96xf32> to vector<8x16xf32>
    %cst_20 = arith.constant dense<0.000000e+00> : vector<8x8xf32>
    %53 = tpu.matmul %50, %51, %cst_20 {dimension_numbers = #tpu.dot_dimension_numbers<[1], [1], [0], [0], [0, 0, 1, 0], [], []>} : vector<8x16xf32>, vector<8x16xf32>, vector<8x8xf32> -> vector<8x8xf32>
    %cst_21 = arith.constant -1.000000e+30 : f32
    %54 = vector.broadcast %cst_21 : f32 to vector<8x8xf32>
    %55 = arith.select %28, %53, %54 : vector<8x8xi1>, vector<8x8xf32>
    %cst_22 = arith.constant dense<0xFF800000> : vector<8xf32>
    %56 = vector.multi_reduction <maximumf>, %55, %cst_22 [1] : vector<8x8xf32> to vector<8xf32>
    %57 = vector.shape_cast %56 : vector<8xf32> to vector<8x1xf32>
    %58 = vector.broadcast %57 : vector<8x1xf32> to vector<8x8xf32>
    %59 = arith.subf %55, %58 : vector<8x8xf32>
    %60 = math.exp %59 : vector<8x8xf32>
    %cst_23 = arith.constant dense<0.000000e+00> : vector<8xf32>
    %61 = vector.multi_reduction <add>, %60, %cst_23 [1] : vector<8x8xf32> to vector<8xf32>
    %62 = vector.shape_cast %61 : vector<8xf32> to vector<8x1xf32>
    %63 = tpu.reciprocal %62 {approx = true} : vector<8x1xf32> -> vector<8x1xf32>
    %64 = vector.broadcast %63 : vector<8x1xf32> to vector<8x8xf32>
    %65 = arith.mulf %60, %64 : vector<8x8xf32>
    %cst_24 = arith.constant dense<0.000000e+00> : vector<8x16xf32>
    %66 = tpu.matmul %65, %52, %cst_24 {dimension_numbers = #tpu.dot_dimension_numbers<[1], [0], [0], [1], [0, 0, 1, 1], [], []>} : vector<8x8xf32>, vector<8x16xf32>, vector<8x16xf32> -> vector<8x16xf32>
    %67 = tpu.concatenate %47, %66 in 1 : vector<8x16xf32>, vector<8x16xf32> -> vector<8x32xf32>
    %c0_25 = arith.constant 0 : index
    %c0_26 = arith.constant 0 : index
    %68 = vector.load %arg5[%c0_25, %c0_26] : memref<32x32xf32, #tpu.memory_space<vmem>>, vector<32x32xf32>
    %cst_27 = arith.constant dense<0.000000e+00> : vector<8x32xf32>
    %69 = tpu.matmul %67, %68, %cst_27 {dimension_numbers = #tpu.dot_dimension_numbers<[1], [0], [0], [1], [0, 0, 1, 1], [], []>} : vector<8x32xf32>, vector<32x32xf32>, vector<8x32xf32> -> vector<8x32xf32>
    %c0_28 = arith.constant 0 : index
    %c0_29 = arith.constant 0 : index
    %70 = vector.load %arg6[%c0_28, %c0_29] : memref<1x32xf32, #tpu.memory_space<vmem>>, vector<1x32xf32>
    %71 = vector.broadcast %70 : vector<1x32xf32> to vector<8x32xf32>
    %72 = arith.addf %69, %71 : vector<8x32xf32>
    %73 = arith.addf %1, %72 : vector<8x32xf32>
    %cst_30 = arith.constant dense<0.000000e+00> : vector<8xf32>
    %74 = vector.multi_reduction <add>, %73, %cst_30 [1] : vector<8x32xf32> to vector<8xf32>
    %75 = vector.shape_cast %74 : vector<8xf32> to vector<8x1xf32>
    %cst_31 = arith.constant 3.200000e+01 : f32
    %76 = vector.broadcast %cst_31 : f32 to vector<8x1xf32>
    %77 = arith.divf %75, %76 : vector<8x1xf32>
    %78 = vector.broadcast %77 : vector<8x1xf32> to vector<8x32xf32>
    %79 = arith.subf %73, %78 : vector<8x32xf32>
    %80 = arith.mulf %79, %79 : vector<8x32xf32>
    %cst_32 = arith.constant dense<0.000000e+00> : vector<8xf32>
    %81 = vector.multi_reduction <add>, %80, %cst_32 [1] : vector<8x32xf32> to vector<8xf32>
    %82 = vector.shape_cast %81 : vector<8xf32> to vector<8x1xf32>
    %cst_33 = arith.constant 3.200000e+01 : f32
    %83 = vector.broadcast %cst_33 : f32 to vector<8x1xf32>
    %84 = arith.divf %82, %83 : vector<8x1xf32>
    %cst_34 = arith.constant 9.99999974E-6 : f32
    %85 = vector.broadcast %cst_34 : f32 to vector<8x1xf32>
    %86 = arith.addf %84, %85 : vector<8x1xf32>
    %87 = math.rsqrt %86 : vector<8x1xf32>
    %88 = vector.broadcast %87 : vector<8x1xf32> to vector<8x32xf32>
    %89 = arith.mulf %79, %88 : vector<8x32xf32>
    %c0_35 = arith.constant 0 : index
    %c0_36 = arith.constant 0 : index
    %90 = vector.load %arg7[%c0_35, %c0_36] : memref<1x32xf32, #tpu.memory_space<vmem>>, vector<1x32xf32>
    %91 = vector.broadcast %90 : vector<1x32xf32> to vector<8x32xf32>
    %92 = arith.mulf %89, %91 : vector<8x32xf32>
    %c0_37 = arith.constant 0 : index
    %c0_38 = arith.constant 0 : index
    %93 = vector.load %arg8[%c0_37, %c0_38] : memref<1x32xf32, #tpu.memory_space<vmem>>, vector<1x32xf32>
    %94 = vector.broadcast %93 : vector<1x32xf32> to vector<8x32xf32>
    %95 = arith.addf %92, %94 : vector<8x32xf32>
    %c0_39 = arith.constant 0 : index
    %c0_40 = arith.constant 0 : index
    %96 = vector.load %arg9[%c0_39, %c0_40] : memref<32x128xf32, #tpu.memory_space<vmem>>, vector<32x128xf32>
    %cst_41 = arith.constant dense<0.000000e+00> : vector<8x128xf32>
    %97 = tpu.matmul %95, %96, %cst_41 {dimension_numbers = #tpu.dot_dimension_numbers<[1], [0], [0], [1], [0, 0, 1, 1], [], []>} : vector<8x32xf32>, vector<32x128xf32>, vector<8x128xf32> -> vector<8x128xf32>
    %c0_42 = arith.constant 0 : index
    %c0_43 = arith.constant 0 : index
    %98 = vector.load %arg10[%c0_42, %c0_43] : memref<1x128xf32, #tpu.memory_space<vmem>>, vector<1x128xf32>
    %99 = vector.broadcast %98 : vector<1x128xf32> to vector<8x128xf32>
    %100 = arith.addf %97, %99 : vector<8x128xf32>
    %cst_44 = arith.constant 0.000000e+00 : f32
    %101 = vector.broadcast %cst_44 : f32 to vector<8x128xf32>
    %102 = arith.maximumf %100, %101 : vector<8x128xf32>
    %c0_45 = arith.constant 0 : index
    %c0_46 = arith.constant 0 : index
    %103 = vector.load %arg11[%c0_45, %c0_46] : memref<128x32xf32, #tpu.memory_space<vmem>>, vector<128x32xf32>
    %cst_47 = arith.constant dense<0.000000e+00> : vector<8x32xf32>
    %104 = tpu.matmul %102, %103, %cst_47 {dimension_numbers = #tpu.dot_dimension_numbers<[1], [0], [0], [1], [0, 0, 1, 1], [], []>} : vector<8x128xf32>, vector<128x32xf32>, vector<8x32xf32> -> vector<8x32xf32>
    %c0_48 = arith.constant 0 : index
    %c0_49 = arith.constant 0 : index
    %105 = vector.load %arg12[%c0_48, %c0_49] : memref<1x32xf32, #tpu.memory_space<vmem>>, vector<1x32xf32>
    %106 = vector.broadcast %105 : vector<1x32xf32> to vector<8x32xf32>
    %107 = arith.addf %104, %106 : vector<8x32xf32>
    %108 = arith.addf %73, %107 : vector<8x32xf32>
    %c0_50 = arith.constant 0 : index
    %c0_51 = arith.constant 0 : index
    %c0_52 = arith.constant 0 : index
    %109 = vector.load %arg13[%c0_50, %c0_51, %c0_52] : memref<1x8x32xf32, #tpu.memory_space<vmem>>, vector<1x8x32xf32>
    %110 = vector.shape_cast %109 : vector<1x8x32xf32> to vector<8x32xf32>
    %111 = vector.shape_cast %108 : vector<8x32xf32> to vector<1x8x32xf32>
    tpu.vector_store %arg13[%c0_50, %c0_51, %c0_52], %111 {strides = array<i32>} : memref<1x8x32xf32, #tpu.memory_space<vmem>>, vector<1x8x32xf32>,
    return
  }
  func.func @transform_0(%arg0: i32) -> (i32, i32, i32) {
    %c0_i32 = arith.constant 0 : i32
    %c0_i32_0 = arith.constant 0 : i32
    %c0_i32_1 = arith.constant 0 : i32
    return %arg0, %c0_i32, %c0_i32_0 : i32, i32, i32
  }
  func.func @transform_1(%arg0: i32) -> (i32, i32) {
    %c0_i32 = arith.constant 0 : i32
    %c0_i32_0 = arith.constant 0 : i32
    %c0_i32_1 = arith.constant 0 : i32
    return %c0_i32, %c0_i32_0 : i32, i32
  }
  func.func @transform_2(%arg0: i32) -> (i32, i32) {
    %c0_i32 = arith.constant 0 : i32
    %c0_i32_0 = arith.constant 0 : i32
    %c0_i32_1 = arith.constant 0 : i32
    return %c0_i32, %c0_i32_0 : i32, i32
  }
  func.func @transform_3(%arg0: i32) -> (i32, i32) {
    %c0_i32 = arith.constant 0 : i32
    %c0_i32_0 = arith.constant 0 : i32
    %c0_i32_1 = arith.constant 0 : i32
    return %c0_i32, %c0_i32_0 : i32, i32
  }
  func.func @transform_4(%arg0: i32) -> (i32, i32) {
    %c0_i32 = arith.constant 0 : i32
    %c0_i32_0 = arith.constant 0 : i32
    %c0_i32_1 = arith.constant 0 : i32
    return %c0_i32, %c0_i32_0 : i32, i32
  }
  func.func @transform_5(%arg0: i32) -> (i32, i32) {
    %c0_i32 = arith.constant 0 : i32
    %c0_i32_0 = arith.constant 0 : i32
    %c0_i32_1 = arith.constant 0 : i32
    return %c0_i32, %c0_i32_0 : i32, i32
  }
  func.func @transform_6(%arg0: i32) -> (i32, i32) {
    %c0_i32 = arith.constant 0 : i32
    %c0_i32_0 = arith.constant 0 : i32
    %c0_i32_1 = arith.constant 0 : i32
    return %c0_i32, %c0_i32_0 : i32, i32
  }
  func.func @transform_7(%arg0: i32) -> (i32, i32) {
    %c0_i32 = arith.constant 0 : i32
    %c0_i32_0 = arith.constant 0 : i32
    %c0_i32_1 = arith.constant 0 : i32
    return %c0_i32, %c0_i32_0 : i32, i32
  }
  func.func @transform_8(%arg0: i32) -> (i32, i32) {
    %c0_i32 = arith.constant 0 : i32
    %c0_i32_0 = arith.constant 0 : i32
    %c0_i32_1 = arith.constant 0 : i32
    return %c0_i32, %c0_i32_0 : i32, i32
  }
  func.func @transform_9(%arg0: i32) -> (i32, i32) {
    %c0_i32 = arith.constant 0 : i32
    %c0_i32_0 = arith.constant 0 : i32
    %c0_i32_1 = arith.constant 0 : i32
    return %c0_i32, %c0_i32_0 : i32, i32
  }
  func.func @transform_10(%arg0: i32) -> (i32, i32) {
    %c0_i32 = arith.constant 0 : i32
    %c0_i32_0 = arith.constant 0 : i32
    %c0_i32_1 = arith.constant 0 : i32
    return %c0_i32, %c0_i32_0 : i32, i32
  }
  func.func @transform_11(%arg0: i32) -> (i32, i32) {
    %c0_i32 = arith.constant 0 : i32
    %c0_i32_0 = arith.constant 0 : i32
    %c0_i32_1 = arith.constant 0 : i32
    return %c0_i32, %c0_i32_0 : i32, i32
  }
  func.func @transform_12(%arg0: i32) -> (i32, i32, i32) {
    %c0_i32 = arith.constant 0 : i32
    %c0_i32_0 = arith.constant 0 : i32
    %c0_i32_1 = arith.constant 0 : i32
    return %arg0, %c0_i32, %c0_i32_0 : i32, i32, i32
  }
}

</mosaic_0001>

<bundles_post_ra>
// kernel: tpu_custom_call.1
= control target key start
LH: loop header
LB: loop body
LE: loop exit
PB: predicated region body
PF: predicated region fallthrough
CT: control target
= control target key end

     0   :  { %s1848_s0 = inlined_call_operand.vmem [shape: f32[2,8,32], index: 0, kind: input, shape index: {}]   ;;  %s1849_s1 = inlined_call_operand.vmem [shape: f32[1,32], index: 1, kind: input, shape index: {}]   ;;  %s1850_s2 = inlined_call_operand.vmem [shape: f32[1,32], index: 2, kind: input, shape index: {}]   ;;  %s1851_s3 = inlined_call_operand.vmem [shape: f32[32,96], index: 3, kind: input, shape index: {}]   ;;  %s1852_s4 = inlined_call_operand.vmem [shape: f32[32,32], index: 4, kind: input, shape index: {}]   ;;  %s1853_s5 = inlined_call_operand.vmem [shape: f32[1,32], index: 5, kind: input, shape index: {}]   ;;  %s1854_s6 = inlined_call_operand.vmem [shape: f32[1,32], index: 6, kind: input, shape index: {}]   ;;  %s1855_s7 = inlined_call_operand.vmem [shape: f32[1,32], index: 7, kind: input, shape index: {}]   ;;  %s1856_s8 = inlined_call_operand.vmem [shape: f32[32,128], index: 8, kind: input, shape index: {}]   ;;  %s1857_s9 = inlined_call_operand.vmem [shape: f32[1,128], index: 9, kind: input, shape index: {}]   ;;  %s1858_s10 = inlined_call_operand.vmem [shape: f32[128,32], index: 10, kind: input, shape index: {}]   ;;  %s1859_s11 = inlined_call_operand.vmem [shape: f32[1,32], index: 11, kind: input, shape index: {}]   ;;  %s1860_s12 = inlined_call_operand.hbm [shape: f32[2,8,32], index: 12, kind: output, shape index: {}]  }
   0x1   :  { %1861 = sst [smem:[#allocation5_spill]] %s1848_s0 }
   0x2   :  { %1862 = sst [smem:[#allocation6_spill]] %s1849_s1 }
   0x3   :  { %1863 = sst [smem:[#allocation7_spill]] %s1850_s2 }
   0x4   :  { %17 = vsyncpa [#allocation3], 0 }
   0x5   :  { %19 = vsyncpa [#allocation3 + $0x1], 0  ;;  %s1579_s21 = smov 0   ;;  %s1581_s22 = smov 0  }
   0x6   :  { %s1583_s23 = smov 0   ;;  %s1585_s24 = smov 0  }
   0x7 LB: > { %s1600_s25 = sadd.s32 4294967295, %s1503_s24   ;;  %s1230_s26 = sadd.s32 4294967294, %s1503_s24   ;;  %s1503_s24 = sphi %s1585_s24, %s1872_s24   ;;  %s1499_s23 = sphi %s1583_s23, %s1871_s23   ;;  %s1495_s22 = sphi %s1581_s22, %s1870_s22   ;;  %s1491_s21 = sphi %s1579_s21, %s1869_s21  }
   0x8   : > { %s1604_s27 = sadd.s32 1, %s1503_s24   ;;  %s289_s28 = sadd.s32 1, %s1499_s23 }
   0x9   : > { %s286_s29 = ssub.s32 %s1503_s24, %s1604_s27  ;;  %p299_p0 = scmp.ne.s32.totalorder %s1499_s23, %s1495_s22 }
   0xa   : > { %p287_p1 = scmp.eq.s32.totalorder %s286_s29, 0  ;;  %p300_p2 = scmp.eq.s32.totalorder %s1600_s25, 1 }
   0xb   : > { %p305_p3 = scmp.ne.s32.totalorder %s1495_s22, %s1491_s21  ;;  %p306_p4 = scmp.eq.s32.totalorder %s1230_s26, 1 }
   0xc   : > { %s1615_s30 = scalar_select %p287_p1, %s1499_s23, %s289_s28  }
   0xd   : > { %p1617_p5 = por %p300_p2, %p299_p0  ;;  %p1621_p6 = por %p306_p4, %p305_p3 }
   0xe   : > { %p1233_p7 = scmp.ge.s32.totalorder %s1503_s24, 1  ;;  %p364_p8 = scmp.lt.s32.totalorder %s1503_s24, 3 }
  0x10   : > { %p365_p9 = pnand %p1233_p7, %p364_p8 }
  0x11   : > { %p405_p10 = scmp.lt.s32.totalorder (!%p365_p9), %s1600_s25, 1  ;;  %s1866_s0 = sld [smem:[#allocation5_spill]] (!%p365_p9) }
  0x12   : > { %368 = sbr.rel (%p365_p9) target bundleno = 2378 (0x94a), region = 68  ;;  %s1867_s1 = sld [smem:[#allocation6_spill]] (!%p365_p9) }
  0x13   : > { %s1868_s2 = sld [smem:[#allocation7_spill]] (!%p365_p9)  ;;  %s1507_s29 = smov (!%p365_p9), 96  }
  0x14   : > { %s1510_s17 = smov (!%p365_p9), 48   ;;  %s1511_s18 = smov (!%p365_p9), 64  }
  0x15   : > { %s402_s28 = sand.u32 (!%p365_p9), 1, %s1495_s22  }
  0x17   : > { %s406_s15 = scalar_select %p405_p10, %s1600_s25, 1  ;;  %vm410_vm0 = vcmask 261120   ;;  %v444_v7 = vld [vmem:[%s1851_s3 + $0x18] sm:$0xff]  ;;  %v1505_v8 = vmov 0.0   ;;  %v443_v9 = vld [vmem:[%s1851_s3 + $0x10] sm:$0xff]  ;;  %vm1506_vm1 = vmmov 0   ;;  %v518_v27 = vlaneseq }
  0x18   : > { %1296 = vmatprep.subr.mxu1 %v1505_v8  ;;  %1304 = vmatprep.mubr.msk.f32.mxu1 %vm1506_vm1, %v1505_v8  ;;  %v442_v10 = vld [vmem:[%s1851_s3 + $0x8] sm:$0xff]  ;;  %v441_v11 = vld [vmem:[%s1851_s3] sm:$0xff]  ;;  %vm527_vm2 = vcmask 130048   ;;  %vm604_vm4 = vcmask 64512   ;;  %v866_v56 = vld [vmem:[%s1852_s4 + $0x18] sm:$0xff] }
  0x19   : > { %s1235_s16 = sshll.u32 %s406_s15, 3  ;;  %1297 = vmatpush3.msra.mxu1 %v444_v7  ;;  %1317 = vmatprep.subr.mxu0 %v1505_v8  ;;  %v1236_v16 = vld [vmem:[%s1867_s1] ss:$0 sm:$0xff]  ;;  %s1508_s15 = smov 112   ;;  %v519_v28 = vshrl.u32 %v518_v27, 7  ;;  %v521_v29 = vand.u32 127, %v518_v27 }
  0x1a   : > { %s408_s19 = scalar_lea.vmem %s1866_s0, %s1235_s16  ;;  %1298 = vmatprep.subr.mxu1 %v1505_v8  ;;  %1319 = vmatprep.mubr.msk.f32.mxu0 %vm1506_vm1, %v1505_v8  ;;  %v1237_v18 = vld [vmem:[%s1868_s2] ss:$0 sm:$0xff]  ;;  %s1509_s16 = smov 80   ;;  %v865_v57 = vld [vmem:[%s1852_s4 + $0x10] sm:$0xff]  ;;  %v864_v58 = vld [vmem:[%s1852_s4 + $0x8] sm:$0xff] }
  0x1b   : > { %v1632_v0 = vld [vmem:[%s408_s19] sm:$0xff]  ;;  %1299 = vmatpush3.msra.mxu1 %v443_v9  ;;  %vm522_vm3 = vcmp.le.s32.totalorder %v521_v29, %v519_v28  ;;  %v1068_v27 = vld [vmem:[%s1858_s10 + $0x30] sm:$0xff]  ;;  %v1067_v28 = vld [vmem:[%s1858_s10 + $0x28] sm:$0xff]  ;;  %s1158_s1 = scalar_lea.sflag [#allocation3], %s402_s28 }
  0x1c   : > { %v411_v1 = vsel %vm410_vm0, %v1632_v0, 0.0  ;;  %1300 = vmatprep.subr.mxu1 %v1505_v8  ;;  %v863_v59 = vld [vmem:[%s1852_s4] sm:$0xff] }
  0x1d   : > { %412 = vadd.xlane.f32.xlu0 %v411_v1  ;;  %1301 = vmatpush3.msra.mxu1 %v442_v10  ;;  %v1066_v29 = vld [vmem:[%s1858_s10 + $0x20] sm:$0xff] }
  0x1e   : > { %1302 = vmatprep.subr.mxu1 %v1505_v8 }
  0x1f   : > { %1303 = vmatpush3.msra.mxu1 %v441_v11 }
  0x20   : > { %1307 = vmatprep.subr.mxu1 %v1505_v8 }
  0xa6   : > { %v413_v2 = vpop.xlane.xlu0 %412 }
  0xa7   : > { %v415_v3 = vmul.f32 0.03125, %v413_v2 }
  0xa9   : > { %v416_v4 = vsub.f32 %v1632_v0, %v415_v3  ;;  %v1245_v3 = vld [vmem:[%s1853_s5] ss:$0 sm:$0xff] }
  0xab   : > { %v417_v5 = vmul.f32 %v416_v4, %v416_v4 }
  0xad   : > { %v418_v6 = vsel %vm410_vm0, %v417_v5, 0.0 }
  0xae   : > { %419 = vadd.xlane.f32.xlu0 %v418_v6 }
 0x137   : > { %v420_v12 = vpop.xlane.xlu0 %419 }
 0x138   : > { %v421_v13 = vmul.f32 0.03125, %v420_v12 }
 0x13a   : > { %v422_v14 = vadd.f32 1e-05, %v421_v13 }
 0x13c   : > { %1431 = vrsqrt.f32 %v422_v14 }
 0x149   : > { %v1432_v15 = vpop.eup %1431 }
 0x14a   : > { %v424_v17 = vmul.f32 %v1432_v15, %v416_v4  ;;  %v980_v15 = vld [vmem:[%s1856_s8 + $0x18] sm:$0xff] }
 0x14c   : > { %v432_v19 = vmul.f32 %v1236_v16, %v424_v17  ;;  %v978_v16 = vld [vmem:[%s1856_s8 + $0x8] sm:$0xff]  ;;  %v977_v17 = vld [vmem:[%s1856_s8] sm:$0xff] }
 0x14e   : > { %v440_v20 = vadd.f32 %v1237_v18, %v432_v19  ;;  %v1077_v18 = vld [vmem:[%s1858_s10 + $0x78] sm:$0xff]  ;;  %v1076_v19 = vld [vmem:[%s1858_s10 + $0x70] sm:$0xff] }
 0x150   : > { %1305 = vmatmul.mubr.msk.f32.vlgmr.msra.gmra.mxu1 %vm410_vm0, %v440_v20  ;;  %v1075_v20 = vld [vmem:[%s1858_s10 + $0x68] sm:$0xff] }
 0x151   : > { %1309 = vmatprep.mubr.msk.f32.mxu1 %vm1506_vm1, %v1505_v8 }
 0x210   : > { %v514_v21 = vpop.f32.mrf.mxu1 }
 0x211   : > { %525 = vrot.lane.b32.xlu1 %v514_v21, %s1507_s29  ;;  %v523_v22 = vmul.f32 0.25, %v514_v21  ;;  %s1234_s29 = sshll.u32 %s402_s28, 3 }
 0x212   : > { %v1306_v23 = vpop.f32.mrf.mxu1 }
 0x213   : > { %692 = vrot.lane.b32.xlu0 %v523_v22, %s1508_s15  ;;  %v1072_v23 = vld [vmem:[%s1858_s10 + $0x50] sm:$0xff] }
 0x215   : > { %694 = vrot.lane.b32.xlu1 %v514_v21, %s1509_s16 }
 0x283   : > { %v526_v24 = vpop.permute.xlu1 %525 }
 0x284   : > { %1308 = vmatpush3.xpose.msk.msra.mxu1 %vm527_vm2, %v526_v24  ;;  %v1071_v24 = vld [vmem:[%s1858_s10 + $0x48] sm:$0xff] }
 0x285   : > { %1312 = vmatprep.subr.mxu1 %v1505_v8  ;;  %v693_v26 = vpop.permute.xlu0 %692 }
 0x287   : > { %v695_v25 = vpop.permute.xlu1 %694  ;;  %1310 = vmatmul.mubr.msk.f32.vlgmr.msra.gmra.mxu1 %vm527_vm2, %v523_v22  ;;  %v1073_v22 = vld [vmem:[%s1858_s10 + $0x58] sm:$0xff] }
 0x288   : > { %1318 = vmatpush3.xpose.msk.msra.mxu0 %vm527_vm2, %v695_v25  ;;  %1314 = vmatprep.mubr.msk.f32.mxu1 %vm1506_vm1, %v1505_v8  ;;  %v1070_v25 = vld [vmem:[%s1858_s10 + $0x40] sm:$0xff] }
 0x289   : > { %1349 = vmatprep.subr.mxu0 %v1505_v8 }
 0x28b   : > { %1320 = vmatmul.mubr.msk.f32.vlgmr.msra.gmra.mxu0 %vm527_vm2, %v693_v26  ;;  %v1069_v26 = vld [vmem:[%s1858_s10 + $0x38] sm:$0xff] }
 0x28c   : > { %1381 = vmatprep.mubr.msk.f32.mxu0 %vm1506_vm1, %v1505_v8  ;;  %1350 = vmatpush3.msra.mxu0 %v1077_v18 }
 0x28d   : > { %1351 = vmatprep.subr.mxu0 %v1505_v8 }
 0x28e   : > { %1352 = vmatpush3.msra.mxu0 %v1076_v19 }
 0x28f   : > { %1353 = vmatprep.subr.mxu0 %v1505_v8 }
 0x290   : > { %1354 = vmatpush3.msra.mxu0 %v1075_v20 }
 0x291   : > { %1355 = vmatprep.subr.mxu0 %v1505_v8 }
 0x347   : > { %v599_v30 = vpop.f32.mrf.mxu1 }
 0x348   : > { %v603_v31 = vsel %vm522_vm3, %v599_v30, -1e+30  ;;  %v1065_v30 = vld [vmem:[%s1858_s10 + $0x18] sm:$0xff] }
 0x349   : > { %v1311_v32 = vpop.f32.mrf.mxu1  ;;  %v605_v33 = vsel %vm604_vm4, %v603_v31, -inf }
 0x34a   : > { %606 = vmax.xlane.f32.xlu1 %v605_v33 }
 0x34b   : > { %v766_v34 = vpop.f32.mrf.mxu0 }
 0x34c   : > { %v770_v35 = vsel %vm522_vm3, %v766_v34, -1e+30 }
 0x34d   : > { %v1321_v36 = vpop.f32.mrf.mxu0  ;;  %v771_v37 = vsel %vm604_vm4, %v770_v35, -inf }
 0x34e   : > { %772 = vmax.xlane.f32.xlu0 %v771_v37  ;;  %v1248_v37 = vld [vmem:[%s1855_s7] ss:$0 sm:$0xff] }
 0x364   : > { %782 = vrot.lane.b32.xlu0 %v514_v21, %s1510_s17  ;;  %s1253_s17 = sshll.u32 %s1600_s25, 7  ;;  %s1513_s25 = smov [#allocation2]  }
 0x365   : > { %s1169_s0 = scalar_lea.hbm %s1860_s12, %s1253_s17 }
 0x3d3   : > { %v607_v38 = vpop.xlane.xlu1 %606 }
 0x3d4   : > { %v608_v39 = vsub.f32 %v603_v31, %v607_v38 }
 0x3d6   : > { %v609_v40 = vmul.f32 1.442695, %v608_v39 }
 0x3d7   : > { %v773_v41 = vpop.xlane.xlu0 %772 }
 0x3d8   : > { %1433 = vpow2.f32 %v609_v40  ;;  %v774_v42 = vsub.f32 %v770_v35, %v773_v41  ;;  %v1247_v35 = vld [vmem:[%s1854_s6] ss:$0 sm:$0xff]  ;;  %v1064_v40 = vld [vmem:[%s1858_s10 + $0x10] sm:$0xff]  ;;  %v1063_v41 = vld [vmem:[%s1858_s10 + $0x8] sm:$0xff] }
 0x3da   : > { %v775_v43 = vmul.f32 1.442695, %v774_v42  ;;  %v1062_v42 = vld [vmem:[%s1858_s10] sm:$0xff] }
 0x3db   : > { %v783_v53 = vpop.permute.xlu0 %782 }
 0x3dc   : > { %1435 = vpow2.f32 %v775_v43  ;;  %v1249_v43 = vld [vmem:[%s1857_s9] ss:$0 sm:$0xff] }
 0x3e5   : > { %v1434_v44 = vpop.eup %1433 }
 0x3e6   : > { %v611_v45 = vsel %vm604_vm4, %v1434_v44, 0.0 }
 0x3e7   : > { %612 = vadd.xlane.f32.xlu1 %v611_v45 }
 0x3e9   : > { %v1436_v46 = vpop.eup %1435 }
 0x3ea   : > { %v777_v47 = vsel %vm604_vm4, %v1436_v46, 0.0 }
 0x3eb   : > { %778 = vadd.xlane.f32.xlu1 %v777_v47 }
 0x3fc   : > { %616 = vrot.lane.b32.xlu1 %v514_v21, %s1511_s18  ;;  %s1512_s18 = smov 16   ;;  %v1074_v21 = vld [vmem:[%s1858_s10 + $0x60] sm:$0xff] }
 0x3fd   : > { %1356 = vmatpush3.msra.mxu0 %v1074_v21 }
 0x3fe   : > { %1357 = vmatprep.subr.mxu0 %v1505_v8 }
 0x3ff   : > { %1358 = vmatpush3.msra.mxu0 %v1073_v22 }
 0x400   : > { %1359 = vmatprep.subr.mxu0 %v1505_v8 }
 0x401   : > { %1360 = vmatpush3.msra.mxu0 %v1072_v23 }
 0x402   : > { %1361 = vmatprep.subr.mxu0 %v1505_v8 }
 0x403   : > { %1362 = vmatpush3.msra.mxu0 %v1071_v24 }
 0x404   : > { %1363 = vmatprep.subr.mxu0 %v1505_v8 }
 0x405   : > { %1364 = vmatpush3.msra.mxu0 %v1070_v25 }
 0x406   : > { %1365 = vmatprep.subr.mxu0 %v1505_v8 }
 0x407   : > { %1366 = vmatpush3.msra.mxu0 %v1069_v26 }
 0x408   : > { %1367 = vmatprep.subr.mxu0 %v1505_v8 }
 0x409   : > { %1368 = vmatpush3.msra.mxu0 %v1068_v27 }
 0x40a   : > { %1369 = vmatprep.subr.mxu0 %v1505_v8 }
 0x40b   : > { %1370 = vmatpush3.msra.mxu0 %v1067_v28 }
 0x40c   : > { %1371 = vmatprep.subr.mxu0 %v1505_v8 }
 0x40d   : > { %1372 = vmatpush3.msra.mxu0 %v1066_v29 }
 0x40e   : > { %1373 = vmatprep.subr.mxu0 %v1505_v8 }
 0x40f   : > { %1374 = vmatpush3.msra.mxu0 %v1065_v30 }
 0x410   : > { %1375 = vmatprep.subr.mxu0 %v1505_v8 }
 0x411   : > { %1376 = vmatpush3.msra.mxu0 %v1064_v40 }
 0x412   : > { %1377 = vmatprep.subr.mxu0 %v1505_v8 }
 0x413   : > { %1378 = vmatpush3.msra.mxu0 %v1063_v41 }
 0x414   : > { %1379 = vmatprep.subr.mxu0 %v1505_v8 }
 0x415   : > { %1380 = vmatpush3.msra.mxu0 %v1062_v42 }
 0x470   : > { %v613_v48 = vpop.xlane.xlu1 %612 }
 0x471   : > { %1437 = vrcp.f32 %v613_v48  ;;  %v1251_v48 = vld [vmem:[%s1859_s11] ss:$0 sm:$0xff] }
 0x474   : > { %v779_v49 = vpop.xlane.xlu1 %778 }
 0x475   : > { %1439 = vrcp.f32 %v779_v49 }
 0x478   : > { %v617_v50 = vpop.permute.xlu1 %616 }
 0x479   : > { %1313 = vmatpush3.msra.mxu1 %v617_v50 }
 0x47a   : > { %1322 = vmatprep.subr.mxu1 %v1505_v8 }
 0x47e   : > { %v1438_v51 = vpop.eup %1437 }
 0x47f   : > { %v615_v52 = vmul.f32 %v1438_v51, %v1434_v44 }
 0x481   : > { %1315 = vmatmul.mubr.msk.f32.vlgmr.msra.gmra.mxu1 %vm604_vm4, %v615_v52 }
 0x482   : > { %v1440_v54 = vpop.eup %1439  ;;  %1323 = vmatpush3.msra.mxu1 %v783_v53  ;;  %1324 = vmatprep.mubr.msk.f32.mxu1 %vm1506_vm1, %v1505_v8 }
 0x483   : > { %v781_v55 = vmul.f32 %v1440_v54, %v1436_v46  ;;  %1327 = vmatprep.subr.mxu1 %v1505_v8 }
 0x485   : > { %1325 = vmatmul.mubr.msk.f32.vlgmr.msra.gmra.mxu1 %vm604_vm4, %v781_v55 }
 0x486   : > { %1335 = vmatprep.mubr.msk.f32.mxu1 %vm1506_vm1, %v1505_v8  ;;  %1328 = vmatpush3.msra.mxu1 %v866_v56 }
 0x487   : > { %1329 = vmatprep.subr.mxu1 %v1505_v8 }
 0x488   : > { %1330 = vmatpush3.msra.mxu1 %v865_v57 }
 0x489   : > { %1331 = vmatprep.subr.mxu1 %v1505_v8 }
 0x48a   : > { %1332 = vmatpush3.msra.mxu1 %v864_v58 }
 0x48b   : > { %1333 = vmatprep.subr.mxu1 %v1505_v8 }
 0x48c   : > { %1334 = vmatpush3.msra.mxu1 %v863_v59 }
 0x48d   : > { %1338 = vmatprep.subr.mxu1 %v1505_v8 }
 0x541   : > { %v688_v60 = vpop.f32.mrf.mxu1 }
 0x543   : > { %v1316_v61 = vpop.f32.mrf.mxu1 }
 0x545   : > { %v854_v62 = vpop.f32.mrf.mxu1 }
 0x546   : > { %859 = vrot.lane.b32.xlu1 %v854_v62, %s1512_s18  ;;  %s404_s18 = scalar_lea.vmem [#allocation2], %s1234_s29  ;;  %s1447_s29 = sshll.u32 %s1513_s25, 4  ;;  %s1448_s29 = int_to_ptr.vmem [resolvable:$false] %s1447_s29 }
 0x547   : > { %v1326_v63 = vpop.f32.mrf.mxu1  ;;  %s1171_s19 = sshll.u32 %s404_s18, 4  ;;  %s1449_s15 = scalar_lea.vmem %s1448_s29, 256  ;;  %s1172_s19 = int_to_ptr.vmem [resolvable:$true] %s1171_s19 }
 0x548   : > { %s1443_s2 = scalar_lea.vmem %s1172_s19, 128  ;;  %p1450_p0 = scmp.lt.s32.totalorder %s1172_s19, %s1448_s29 }
 0x549   : > { %p1444_p11 = scmp.ne.s32.totalorder %s1172_s19, %s1443_s2  ;;  %p1451_p1 = scmp.lt.s32.totalorder %s1449_s15, %s1443_s2 }
 0x54b   : > { %p1445_p12 = pnand %p1444_p11, %p1617_p5  ;;  %p1452_p2 = por %p1451_p1, %p1450_p0 }
 0x54d   : > { %p1446_p13 = pneg %p1445_p12 }
 0x54f   : > { %p1453_p3 = pnand %p1452_p2, %p1446_p13 }
 0x5b8   : > { %v860_v1 = vpop.permute.xlu1 %859 }
 0x5b9   : > { %v862_v2 = vsel %vm527_vm2, %v688_v60, %v860_v1 }
 0x5ba   : > { %1336 = vmatmul.mubr.msk.f32.vlgmr.msra.gmra.mxu1 %vm410_vm0, %v862_v2 }
 0x5bb   : > { %1346 = vmatprep.mubr.msk.f32.mxu1 %vm1506_vm1, %v1505_v8  ;;  %1339 = vmatpush3.msra.mxu1 %v980_v15 }
 0x5bc   : > { %1340 = vmatprep.subr.mxu1 %v1505_v8 }
 0x67a   : > { %v943_v4 = vpop.f32.mrf.mxu1 }
 0x67b   : > { %v944_v5 = vadd.f32 %v1245_v3, %v943_v4 }
 0x67c   : > { %v1337_v6 = vpop.f32.mrf.mxu1 }
 0x67d   : > { %v1715_v7 = vadd.f32 %v944_v5, %v1632_v0  ;;  %v979_v0 = vld [vmem:[%s1856_s8 + $0x10] sm:$0xff] }
 0x67e   : > { %1341 = vmatpush3.msra.mxu1 %v979_v0 }
 0x67f   : > { %v948_v9 = vsel %vm410_vm0, %v1715_v7, 0.0  ;;  %1342 = vmatprep.subr.mxu1 %v1505_v8 }
 0x680   : > { %949 = vadd.xlane.f32.xlu1 %v948_v9  ;;  %1343 = vmatpush3.msra.mxu1 %v978_v16 }
 0x681   : > { %1344 = vmatprep.subr.mxu1 %v1505_v8 }
 0x682   : > { %1345 = vmatpush3.msra.mxu1 %v977_v17 }
 0x709   : > { %v950_v10 = vpop.xlane.xlu1 %949 }
 0x70a   : > { %v951_v11 = vmul.f32 0.03125, %v950_v10 }
 0x70c   : > { %v952_v12 = vsub.f32 %v1715_v7, %v951_v11 }
 0x70e   : > { %v953_v13 = vmul.f32 %v952_v12, %v952_v12 }
 0x710   : > { %v954_v14 = vsel %vm410_vm0, %v953_v13, 0.0 }
 0x711   : > { %955 = vadd.xlane.f32.xlu0 %v954_v14 }
 0x79a   : > { %v956_v31 = vpop.xlane.xlu0 %955 }
 0x79b   : > { %v957_v32 = vmul.f32 0.03125, %v956_v31 }
 0x79d   : > { %v958_v33 = vadd.f32 1e-05, %v957_v32 }
 0x79f   : > { %1441 = vrsqrt.f32 %v958_v33 }
 0x7ac   : > { %v1442_v34 = vpop.eup %1441 }
 0x7ad   : > { %v960_v36 = vmul.f32 %v1442_v34, %v952_v12 }
 0x7af   : > { %v968_v38 = vmul.f32 %v1247_v35, %v960_v36 }
 0x7b1   : > { %v976_v39 = vadd.f32 %v1248_v37, %v968_v38 }
 0x7b3   : > { %1347 = vmatmul.mubr.msk.f32.vlgmr.msra.gmra.mxu1 %vm410_vm0, %v976_v39 }
 0x873   : > { %v1057_v44 = vpop.f32.mrf.mxu1 }
 0x874   : > { %v1058_v45 = vadd.f32 %v1249_v43, %v1057_v44 }
 0x875   : > { %v1348_v46 = vpop.f32.mrf.mxu1 }
 0x876   : > { %v1061_v47 = vmax.f32 %v1058_v45, 0.0 }
 0x878   : > { %1382 = vmatmul.mubr.f32.vlgmr.msra.gmra.mxu0 %v1061_v47 }
 0x938   : > { %v1151_v49 = vpop.f32.mrf.mxu0 }
 0x939   : > { %v1152_v8 = vadd.f32 %v1251_v48, %v1151_v49 }
 0x93a   : > { %v1383_v50 = vpop.f32.mrf.mxu0 }
 0x93b   : > { %v1155_v51 = vadd.f32 %v1152_v8, %v1715_v7 }
 0x93d   : > { %1156 = vst.msk [vmem:[%s404_s18] sm:$0xff] %vm410_vm0, %v1155_v51 }
 0x93e   : > { %1456 = shalt.err (!%p1453_p3)
}
 0x93f   : > { %s1457_s16 = scalar_lea.hbm %s1169_s0, 128  ;;  %s1461_s18 = scalar_lea.hbm %s1860_s12, 256 }
 0x940   : > { %p1458_p4 = scmp.ne.s32.totalorder %s1169_s0, %s1457_s16  ;;  %p1462_p9 = scmp.lt.s32.totalorder %s1169_s0, %s1860_s12 }
 0x941   : > { %p1463_p10 = scmp.lt.s32.totalorder %s1461_s18, %s1457_s16 }
 0x942   : > { %p1459_p7 = pnand %p1458_p4, %p1617_p5 }
 0x943   : > { %p1464_p11 = por %p1463_p10, %p1462_p9 }
 0x944   : > { %p1460_p8 = pneg %p1459_p7 }
 0x946   : > { %p1465_p12 = pnand %p1464_p11, %p1460_p8 }
 0x948   : > { %1468 = shalt.err (!%p1465_p12)
}
 0x949   : > { %1384 = dma.vmem_to_hbm [thread:$0]  (%p1617_p5), %s1172_s19, 128, %s1169_s0, %s1158_s1  }
 0x94a PF: > { %p1390_p13 = scmp.ge.s32.totalorder %s1503_s24, 2  ;;  %s1183_s2 = sand.u32 1, %s1491_s21  }
 0x94b   : > { %s1184_s25 = scalar_lea.sflag [#allocation3], %s1183_s2 }
 0x94c   : > { %p1387_p0 = pnand %p1390_p13, %p1621_p6 }
 0x94e   : > { %p1388_p1 = pneg %p1387_p0 }
 0x950   : > { %1486 = dma.done.wait (%p1388_p1), %s1184_s25, 128  }
 0x951   : > { %1488 = vsyncadd (%p1388_p1), %s1184_s25, 4294967168  ;;  %p22_p2 = scmp.ge.s32.totalorder %s1604_s27, 4   ;;  %s1869_s21 = smov %s1495_s22 }
 0x952   : > { %s1870_s22 = smov %s1499_s23  ;;  %s1871_s23 = smov %s1615_s30 }
 0x953   : > { %s1872_s24 = smov %s1604_s27  ;;  %24 = sbr.rel (!%p22_p2) target bundleno = 7 (0x7), region = 103 }
 0x958   :  { %1189 = vsyncpa [#allocation3], 1 }
 0x959   :  { %1191 = vsyncpa [#allocation3 + $0x1], 1 }

</bundles_post_ra>
